<compile_context>
chip_gen: v7x
topology: tpu7x:2x2x1
jax: 0.10.0
libtpu: 0.0.40
codegen_flags: <defaults>
</compile_context>

<pallas_src>
import numpy as np

import jax
import jax.numpy as jnp
from jax.experimental import pallas as pl
from jax.experimental.pallas import tpu as pltpu


# ----------------------------------------------------------------------------
# Bilinear upsample, align_corners=True  (plain-JAX glue; exact PyTorch match)
# ----------------------------------------------------------------------------
def _interp_matrix(out_size: int, in_size: int) -> jnp.ndarray:
    """Row-stochastic (out_size, in_size) matrix for 1-D linear interpolation
    with align_corners=True (PyTorch F.interpolate semantics)."""
    if in_size == 1 or out_size == 1:
        m = np.zeros((out_size, in_size), dtype=np.float32)
        m[:, 0] = 1.0
        return jnp.asarray(m)
    src = np.arange(out_size, dtype=np.float64) * (in_size - 1) / (out_size - 1)
    i0 = np.clip(np.floor(src).astype(np.int64), 0, in_size - 1)
    i1 = np.minimum(i0 + 1, in_size - 1)
    w1 = (src - i0).astype(np.float32)
    w0 = 1.0 - w1
    m = np.zeros((out_size, in_size), dtype=np.float32)
    m[np.arange(out_size), i0] += w0
    m[np.arange(out_size), i1] += w1
    return jnp.asarray(m)


def bilinear_upsample_to_nhwc(x_nchw: jnp.ndarray, out_h: int, out_w: int,
                              out_dtype=jnp.float32) -> jnp.ndarray:
    """(B, C, H, W) -> (B, out_h, out_w, C), bilinear, align_corners=True.

    Forced two-step contraction (W first, then H) that lands directly in
    NHWC, so no full-resolution transpose or badly-ordered 3-operand einsum
    intermediate is materialized.  Interpolation math in f32; result cast to
    `out_dtype` (bf16 on the fast path) so the concat tensor is half-size.
    """
    _, _, h, w = x_nchw.shape
    wh = _interp_matrix(out_h, h)   # (out_h, h)
    ww = _interp_matrix(out_w, w)   # (out_w, w)
    x_nhwc = jnp.transpose(x_nchw, (0, 2, 3, 1)).astype(jnp.float32)  # low-res
    t = jnp.einsum("pw,bhwc->bhpc", ww, x_nhwc)    # contract W  -> (B,H,oW,C)
    y = jnp.einsum("oh,bhpc->bopc", wh, t)         # contract H  -> (B,oH,oW,C)
    return y.astype(out_dtype)


def _round_up(x: int, m: int) -> int:
    return pl.cdiv(x, m) * m


# ----------------------------------------------------------------------------
# Pallas kernel:  relu(feats @ W1' + b1') @ W2 + b2
#   (W1'/b1' have conv bias + eval-mode BatchNorm folded in; all operands are
#    padded to 128-multiples in the wrapper.)
# ----------------------------------------------------------------------------
def _decoder_kernel(feats_ref, w1_ref, b1_ref, w2_ref, b2_ref, out_ref):
    # First 1x1 conv on the MXU (bf16 operands, f32 accumulation).
    h = jnp.dot(feats_ref[...], w1_ref[...],
                preferred_element_type=jnp.float32)          # (tm, C_pad) f32
    # Folded conv-bias + BatchNorm shift, then ReLU (f32 elementwise, VPU).
    h = jnp.maximum(h + b1_ref[...], 0.0)
    # Second 1x1 conv to (padded) class logits.
    o = jnp.dot(h.astype(w2_ref.dtype), w2_ref[...],
                preferred_element_type=jnp.float32)          # (tm, NC_pad) f32
    out_ref[...] = (o + b2_ref[...]).astype(out_ref.dtype)   # bf16 store


def _make_decoder_call(m, tm, c_pad, nc_pad, out_dtype):
    grid = (pl.cdiv(m, tm),)

    # Advisory cost estimate for XLA's scheduler around the custom call.
    flops = 2 * m * c_pad * (c_pad + nc_pad)
    bytes_accessed = (m * c_pad * 2                 # feats (bf16)
                      + c_pad * c_pad * 2           # W1 (bf16)
                      + c_pad * nc_pad * 2          # W2 (bf16)
                      + (c_pad + nc_pad) * 4        # biases (f32)
                      + m * nc_pad * 2)             # out (bf16)

    # VMEM footprint of one pipelined step (double-buffered feats/out,
    # double-buffered weights, f32 intermediate), plus headroom for compiler
    # scratch.  Capped well under v7x's 64 MiB physical VMEM.
    vmem_est = (2 * tm * c_pad * 2                  # feats, 2 buffers, bf16
                + 2 * tm * nc_pad * 2               # out,   2 buffers, bf16
                + 2 * (c_pad * c_pad * 2 + c_pad * nc_pad * 2
                       + c_pad * 4 + nc_pad * 4)    # weights/biases, 2 buffers
                + tm * c_pad * 4)                   # f32 intermediate h
    vmem_limit = min(int(vmem_est * 1.75) + (2 << 20), 56 * 1024 * 1024)

    return pl.pallas_call(
        _decoder_kernel,
        out_shape=jax.ShapeDtypeStruct((m, nc_pad), out_dtype),
        grid_spec=pltpu.PrefetchScalarGridSpec(
            num_scalar_prefetch=0,
            grid=grid,
            in_specs=[
                pl.BlockSpec((tm, c_pad), lambda i: (i, 0)),     # feature rows
                pl.BlockSpec((c_pad, c_pad), lambda i: (0, 0)),  # folded W1
                pl.BlockSpec((1, c_pad), lambda i: (0, 0)),      # folded bias
                pl.BlockSpec((c_pad, nc_pad), lambda i: (0, 0)), # padded W2
                pl.BlockSpec((1, nc_pad), lambda i: (0, 0)),     # padded b2
            ],
            out_specs=pl.BlockSpec((tm, nc_pad), lambda i: (i, 0)),
        ),
        compiler_params=pltpu.CompilerParams(
            dimension_semantics=("parallel",),   # row tiles split across TCs
            vmem_limit_bytes=vmem_limit,
        ),
        cost_estimate=pl.CostEstimate(flops=flops, transcendentals=0,
                                      bytes_accessed=bytes_accessed),
    )


def decoder_last_layer(feats_2d, w1, b1, w2, b2, *, tm=2048,
                       matmul_dtype=jnp.bfloat16, out_dtype=jnp.bfloat16):
    """feats_2d: (M, C_pad) NHWC-flattened features (C already 128-padded,
    already bf16 on the fast path).  w1/b1: folded conv1+BN padded to
    (C_pad, C_pad)/(1, C_pad).  w2/b2: conv2 padded to (C_pad, NC_pad)/
    (1, NC_pad).  Returns (M, NC_pad) `out_dtype` logits; caller slices off
    the class padding.  No row padding: Pallas masks the ragged last tile."""
    m, c_pad = feats_2d.shape
    nc_pad = w2.shape[1]

    # Don't allocate tiles larger than the (rounded-up) problem.
    tm = int(min(tm, _round_up(m, 256)))

    if feats_2d.dtype != matmul_dtype:          # no-op when already bf16
        feats_2d = feats_2d.astype(matmul_dtype)

    call = _make_decoder_call(m, tm, c_pad, nc_pad, out_dtype)
    return call(feats_2d,
                w1.astype(matmul_dtype), b1.astype(jnp.float32),
                w2.astype(matmul_dtype), b2.astype(jnp.float32))


# ----------------------------------------------------------------------------
# Parameter handling (fold conv1 bias + eval-mode BN, pad to 128-multiples)
# ----------------------------------------------------------------------------
def fold_and_pad_params(params, c, c_pad, nc, nc_pad, eps=1e-5):
    inv_std = 1.0 / jnp.sqrt(params["var"] + eps)
    bn_scale = params["gamma"] * inv_std                       # (C,)
    bn_shift = params["beta"] - params["mean"] * bn_scale      # (C,)
    w1f = params["w1"] * bn_scale[None, :]                     # scale out-cols
    b1f = params["b1"] * bn_scale + bn_shift                   # folded bias

    w1p = jnp.zeros((c_pad, c_pad), jnp.float32).at[:c, :c].set(w1f)
    b1p = jnp.zeros((1, c_pad), jnp.float32).at[0, :c].set(b1f)
    w2p = jnp.zeros((c_pad, nc_pad), jnp.float32).at[:c, :nc].set(params["w2"])
    b2p = jnp.zeros((1, nc_pad), jnp.float32).at[0, :nc].set(params["b2"])
    return w1p, b1p, w2p, b2p


# ----------------------------------------------------------------------------
# Full forward
# ----------------------------------------------------------------------------
def hrnet_fpn_seg_decoder_forward(xs, params, *, tm=2048,
                                  feat_dtype=jnp.bfloat16):
    """xs: list of 4 NCHW arrays.  Returns NCHW (B, n_classes, H0, W0) f32."""
    assert len(xs) == 4
    b, _, h0, w0 = xs[0].shape

    # Build the concatenated feature map directly in NHWC bf16 (interpolation
    # in f32, result bf16) and fuse the channel zero-pad into the concat, so
    # the only full-resolution HBM tensor is the bf16 (M, C_pad) feats.
    ups = [jnp.transpose(xs[0], (0, 2, 3, 1)).astype(feat_dtype)]
    ups += [bilinear_upsample_to_nhwc(xi, h0, w0, out_dtype=feat_dtype)
            for xi in xs[1:]]
    c_total = sum(int(u.shape[-1]) for u in ups)
    c_pad = _round_up(c_total, 128)
    if c_pad != c_total:
        ups.append(jnp.zeros((b, h0, w0, c_pad - c_total), feat_dtype))
    feats_2d = jnp.concatenate(ups, axis=-1).reshape(b * h0 * w0, c_pad)

    nc = params["w2"].shape[1]
    nc_pad = _round_up(nc, 128)
    w1p, b1p, w2p, b2p = fold_and_pad_params(params, c_total, c_pad, nc, nc_pad)

    out_2d = decoder_last_layer(feats_2d, w1p, b1p, w2p, b2p, tm=tm)

    # Tiny slice (nc << 128 columns); cast back to f32 for module parity.
    out = out_2d[:, :nc].astype(jnp.float32).reshape(b, h0, w0, nc)
    return jnp.transpose(out, (0, 3, 1, 2))                    # back to NCHW


def make_params(key, last_inp_channels, n_classes):
    """Deterministic synthetic parameters (torch-style, BN in eval mode).
    NOTE: w1/w2 here are (C_in, C_out); PyTorch Conv2d weights are
    (C_out, C_in, 1, 1) and must be transposed when importing checkpoints."""
    c = last_inp_channels
    ks = jax.random.split(key, 8)
    w1 = jax.random.normal(ks[0], (c, c), jnp.float32) * 0.05
    b1 = jax.random.normal(ks[1], (c,), jnp.float32) * 0.05
    gamma = 1.0 + 0.1 * jax.random.normal(ks[2], (c,), jnp.float32)
    beta = 0.1 * jax.random.normal(ks[3], (c,), jnp.float32)
    mean = 0.1 * jax.random.normal(ks[4], (c,), jnp.float32)
    var = jnp.abs(jax.random.normal(ks[5], (c,), jnp.float32)) + 0.5
    w2 = jax.random.normal(ks[6], (c, n_classes), jnp.float32) * 0.05
    b2 = jax.random.normal(ks[7], (n_classes,), jnp.float32) * 0.05
    return dict(w1=w1, b1=b1, gamma=gamma, beta=beta, mean=mean, var=var,
                w2=w2, b2=b2)


def reference_forward(xs, params, eps=1e-5):
    """Pure-JAX f32 reference of the same forward pass (un-folded BN path)."""
    b, _, h0, w0 = xs[0].shape
    ups = [jnp.transpose(xs[0], (0, 2, 3, 1)).astype(jnp.float32)]
    ups += [bilinear_upsample_to_nhwc(xi, h0, w0, out_dtype=jnp.float32)
            for xi in xs[1:]]
    f = jnp.concatenate(ups, axis=-1).reshape(b * h0 * w0, -1)
    h = f @ params["w1"] + params["b1"]
    h = (h - params["mean"]) / jnp.sqrt(params["var"] + eps) * params["gamma"] \
        + params["beta"]
    h = jnp.maximum(h, 0.0)
    o = h @ params["w2"] + params["b2"]
    nc = params["w2"].shape[1]
    return jnp.transpose(o.reshape(b, h0, w0, nc), (0, 3, 1, 2))


if __name__ == "__main__":
    key = jax.random.PRNGKey(0)
    k0, k1, k2, k3, kp = jax.random.split(key, 5)

    # Small HRNet-like pyramid: 4 branches at decreasing resolution.
    B = 2
    branch_channels = [4, 8, 16, 32]          # last_inp_channels = 60
    H0, W0 = 16, 16
    n_classes = 5

    xs = [
        jax.random.normal(k0, (B, branch_channels[0], H0, W0), jnp.float32),
        jax.random.normal(k1, (B, branch_channels[1], H0 // 2, W0 // 2), jnp.float32),
        jax.random.normal(k2, (B, branch_channels[2], H0 // 4, W0 // 4), jnp.float32),
        jax.random.normal(k3, (B, branch_channels[3], H0 // 8, W0 // 8), jnp.float32),
    ]
    params = make_params(kp, sum(branch_channels), n_classes)

    # tm=192 so the test exercises a multi-step grid with a ragged last tile
    # (M = 2*16*16 = 512 rows -> grid of 3, last tile 128 valid rows).
    # Real images should use the default tm=2048.
    out = hrnet_fpn_seg_decoder_forward(xs, params, tm=192)
    out = jax.block_until_ready(out)

    ref = reference_forward(xs, params)
    assert out.shape == (B, n_classes, H0, W0), out.shape
    # bf16 matmul operands / bf16 logits (f32 accumulation) -> loosened tol.
    np.testing.assert_allclose(np.asarray(out), np.asarray(ref),
                               rtol=2e-2, atol=2e-2)
    print("KERNEL_OK")
</pallas_src>

<mosaic_0001>
module attributes {stable_mosaic.version = 11 : i64} {
  func.func @_decoder_kernel(%arg0: i32, %arg1: memref<192x128xbf16, #tpu.memory_space<vmem>>, %arg2: memref<128x128xbf16, #tpu.memory_space<vmem>>, %arg3: memref<1x128xf32, #tpu.memory_space<vmem>>, %arg4: memref<128x128xbf16, #tpu.memory_space<vmem>>, %arg5: memref<1x128xf32, #tpu.memory_space<vmem>>, %arg6: memref<192x128xbf16, #tpu.memory_space<vmem>>) attributes {dimension_semantics = [#tpu.dimension_semantics<parallel>], iteration_bounds = array<i64: 3>, scalar_prefetch = 0 : i64, scratch_operands = 0 : i64, tpu.core_type = #tpu.core_type<tc>, window_params = [{transform_indices = @transform_0, window_bounds = array<i64: 192, 128>}, {pipeline_mode = #tpu.pipeline_mode<synchronous>, transform_indices = @transform_1, window_bounds = array<i64: 128, 128>}, {pipeline_mode = #tpu.pipeline_mode<synchronous>, transform_indices = @transform_2, window_bounds = array<i64: 1, 128>}, {pipeline_mode = #tpu.pipeline_mode<synchronous>, transform_indices = @transform_3, window_bounds = array<i64: 128, 128>}, {pipeline_mode = #tpu.pipeline_mode<synchronous>, transform_indices = @transform_4, window_bounds = array<i64: 1, 128>}, {transform_indices = @transform_5, window_bounds = array<i64: 192, 128>}]} {
    %c0 = arith.constant 0 : index
    %c0_0 = arith.constant 0 : index
    %0 = vector.load %arg1[%c0, %c0_0] : memref<192x128xbf16, #tpu.memory_space<vmem>>, vector<192x128xbf16>
    %c0_1 = arith.constant 0 : index
    %c0_2 = arith.constant 0 : index
    %1 = vector.load %arg2[%c0_1, %c0_2] : memref<128x128xbf16, #tpu.memory_space<vmem>>, vector<128x128xbf16>
    %cst = arith.constant dense<0.000000e+00> : vector<192x128xf32>
    %2 = tpu.matmul %0, %1, %cst {dimension_numbers = #tpu.dot_dimension_numbers<[1], [0], [0], [1], [0, 0, 1, 1], [], []>} : vector<192x128xbf16>, vector<128x128xbf16>, vector<192x128xf32> -> vector<192x128xf32>
    %c0_3 = arith.constant 0 : index
    %c0_4 = arith.constant 0 : index
    %3 = vector.load %arg3[%c0_3, %c0_4] : memref<1x128xf32, #tpu.memory_space<vmem>>, vector<1x128xf32>
    %4 = vector.broadcast %3 : vector<1x128xf32> to vector<192x128xf32>
    %5 = arith.addf %2, %4 : vector<192x128xf32>
    %cst_5 = arith.constant 0.000000e+00 : f32
    %6 = vector.broadcast %cst_5 : f32 to vector<192x128xf32>
    %7 = arith.maximumf %5, %6 : vector<192x128xf32>
    %8 = arith.truncf %7 : vector<192x128xf32> to vector<192x128xbf16>
    %c0_6 = arith.constant 0 : index
    %c0_7 = arith.constant 0 : index
    %9 = vector.load %arg4[%c0_6, %c0_7] : memref<128x128xbf16, #tpu.memory_space<vmem>>, vector<128x128xbf16>
    %cst_8 = arith.constant dense<0.000000e+00> : vector<192x128xf32>
    %10 = tpu.matmul %8, %9, %cst_8 {dimension_numbers = #tpu.dot_dimension_numbers<[1], [0], [0], [1], [0, 0, 1, 1], [], []>} : vector<192x128xbf16>, vector<128x128xbf16>, vector<192x128xf32> -> vector<192x128xf32>
    %c0_9 = arith.constant 0 : index
    %c0_10 = arith.constant 0 : index
    %11 = vector.load %arg5[%c0_9, %c0_10] : memref<1x128xf32, #tpu.memory_space<vmem>>, vector<1x128xf32>
    %12 = vector.broadcast %11 : vector<1x128xf32> to vector<192x128xf32>
    %13 = arith.addf %10, %12 : vector<192x128xf32>
    %14 = arith.truncf %13 : vector<192x128xf32> to vector<192x128xbf16>
    %c0_11 = arith.constant 0 : index
    %c0_12 = arith.constant 0 : index
    %15 = vector.load %arg6[%c0_11, %c0_12] : memref<192x128xbf16, #tpu.memory_space<vmem>>, vector<192x128xbf16>
    tpu.vector_store %arg6[%c0_11, %c0_12], %14 {strides = array<i32>} : memref<192x128xbf16, #tpu.memory_space<vmem>>, vector<192x128xbf16>,
    return
  }
  func.func @transform_0(%arg0: i32) -> (i32, i32) {
    %c0_i32 = arith.constant 0 : i32
    %c0_i32_0 = arith.constant 0 : i32
    return %arg0, %c0_i32 : i32, i32
  }
  func.func @transform_1(%arg0: i32) -> (i32, i32) {
    %c0_i32 = arith.constant 0 : i32
    %c0_i32_0 = arith.constant 0 : i32
    %c0_i32_1 = arith.constant 0 : i32
    return %c0_i32, %c0_i32_0 : i32, i32
  }
  func.func @transform_2(%arg0: i32) -> (i32, i32) {
    %c0_i32 = arith.constant 0 : i32
    %c0_i32_0 = arith.constant 0 : i32
    %c0_i32_1 = arith.constant 0 : i32
    return %c0_i32, %c0_i32_0 : i32, i32
  }
  func.func @transform_3(%arg0: i32) -> (i32, i32) {
    %c0_i32 = arith.constant 0 : i32
    %c0_i32_0 = arith.constant 0 : i32
    %c0_i32_1 = arith.constant 0 : i32
    return %c0_i32, %c0_i32_0 : i32, i32
  }
  func.func @transform_4(%arg0: i32) -> (i32, i32) {
    %c0_i32 = arith.constant 0 : i32
    %c0_i32_0 = arith.constant 0 : i32
    %c0_i32_1 = arith.constant 0 : i32
    return %c0_i32, %c0_i32_0 : i32, i32
  }
  func.func @transform_5(%arg0: i32) -> (i32, i32) {
    %c0_i32 = arith.constant 0 : i32
    %c0_i32_0 = arith.constant 0 : i32
    return %arg0, %c0_i32 : i32, i32
  }
}

</mosaic_0001>

<bundles_post_ra>
// kernel: tpu_custom_call.1
= control target key start
LH: loop header
LB: loop body
LE: loop exit
PB: predicated region body
PF: predicated region fallthrough
CT: control target
= control target key end

     0   :  { %10 = vsyncpa [#allocation3], 0  ;;  %s1969_s0 = inlined_call_operand.hbm [shape: bf16[512,128], index: 0, kind: input, shape index: {}]   ;;  %s1970_s1 = inlined_call_operand.hbm [shape: bf16[128,128], index: 1, kind: input, shape index: {}]   ;;  %s1971_s2 = inlined_call_operand.vmem [shape: f32[1,128], index: 2, kind: input, shape index: {}]   ;;  %s1972_s3 = inlined_call_operand.hbm [shape: bf16[128,128], index: 3, kind: input, shape index: {}]   ;;  %s1973_s4 = inlined_call_operand.vmem [shape: f32[1,128], index: 4, kind: input, shape index: {}]   ;;  %s1974_s5 = inlined_call_operand.hbm [shape: bf16[512,128], index: 5, kind: output, shape index: {}]  }
   0x1   :  { %12 = vsyncpa [#allocation3 + $0x1], 0 }
   0x2   :  { %13 = vsyncpa [#allocation6], 0 }
   0x3   :  { %14 = vsyncpa [#allocation4], 0 }
   0x4   :  { %16 = vsyncpa [#allocation4 + $0x1], 0  ;;  %s1636_s18 = smov 0   ;;  %s1638_s19 = smov 0  }
   0x5   :  { %s1640_s20 = smov 0   ;;  %s1642_s21 = smov 0  }
   0x6 LB: > { %s1657_s22 = sadd.s32 4294967295, %s1594_s21   ;;  %s1053_s23 = sadd.s32 4294967294, %s1594_s21   ;;  %s1594_s21 = sphi %s1642_s21, %s1996_s21   ;;  %s1590_s20 = sphi %s1640_s20, %s1995_s20   ;;  %s1586_s19 = sphi %s1638_s19, %s1994_s19   ;;  %s1582_s18 = sphi %s1636_s18, %s1993_s18  }
   0x7   : > { %s1661_s24 = sadd.s32 1, %s1594_s21   ;;  %s29_s25 = sadd.s32 1, %s1590_s20 }
   0x8   : > { %s26_s26 = ssub.s32 %s1594_s21, %s1661_s24  ;;  %p36_p0 = scmp.ne.s32.totalorder %s1590_s20, %s1586_s19 }
   0x9   : > { %p27_p1 = scmp.eq.s32.totalorder %s26_s26, 0  ;;  %p37_p2 = scmp.eq.s32.totalorder %s1594_s21, 0 }
   0xa   : > { %p42_p3 = scmp.ne.s32.totalorder %s1586_s19, %s1582_s18  ;;  %p1975_p4 = scmp.eq.s32.totalorder %s1657_s22, 0 }
   0xb   : > { %s1673_s27 = scalar_select %p27_p1, %s1590_s20, %s29_s25  }
   0xc   : > { %p1675_p5 = por %p37_p2, %p36_p0  ;;  %p1681_p6 = por %p1975_p4, %p42_p3 }
   0xd   : > { %1978 = sst [smem:[#allocation12_spill]] %s1673_s27  ;;  %p150_p7 = scmp.eq.s32.totalorder %s1657_s22, 2 }
   0xe   : > { %s1979_s28 = scalar_select %p1675_p5, 1, 0 }
   0xf   : > { %s1980_s29 = scalar_select %p1681_p6, 1, 0 }
  0x10   : > { %p156_p8 = scmp.eq.s32.totalorder %s1053_s23, 2  ;;  %p1054_p9 = scmp.ge.s32.totalorder %s1594_s21, 1 }
  0x11   : > { %p163_p10 = scmp.lt.s32.totalorder %s1594_s21, 4  ;;  %p1688_p11 = por %p150_p7, %p36_p0 }
  0x12   : > { %p1692_p12 = por %p156_p8, %p42_p3  ;;  %s1596_s8 = smov [#allocation5]  }
  0x13   : > { %s1981_s30 = scalar_select %p1688_p11, 1, 0 }
  0x14   : > { %s1982_s6 = scalar_select %p1692_p12, 1, 0 }
  0x15   : > { %p1696_p13 = pnand %p1054_p9, %p163_p10  ;;  %s175_s9 = sshll.u32 %s1596_s8, 4  ;;  %s176_s9 = int_to_ptr.vmem [resolvable:$true] %s175_s9 }
  0x16   : > { %s1597_s11 = smov [#allocation7]   ;;  %s1440_s15 = scalar_lea.hbm %s1970_s1, 1024 }
  0x17   : > { %s1983_s7 = scalar_select %p1696_p13, 1, 0 }
  0x18   : > { %p1356_p1 = pneg %p1696_p13  ;;  %s191_s12 = sshll.u32 %s1597_s11, 4  ;;  %s1708_s12 = int_to_ptr.vmem [resolvable:$true] %s191_s12 }
  0x19   : > { %p1441_p0 = scmp.ne.s32.totalorder %s1970_s1, %s1440_s15  ;;  %p1447_p9 = scmp.lt.u32.totalorder %s1440_s15, %s1970_s1 }
  0x1a   : > { %p1704_p2 = pnand %p1356_p1, %p1975_p4 }
  0x1c   : > { %p1442_p3 = pneg %p1704_p2 }
  0x1e   : > { %p1443_p7 = pnand %p1442_p3, %p1441_p0 }
  0x20   : > { %p1444_p8 = pneg %p1443_p7 }
  0x22   : > { %p1449_p10 = pnand %p1447_p9, %p1444_p8 }
  0x24   : > { %1452 = shalt.err (!%p1449_p10)
}
  0x25   : > { %s1453_s26 = scalar_lea.vmem %s176_s9, 1024  ;;  %p1461_p11 = scmp.lt.s32.totalorder %s176_s9, %s176_s9 }
  0x26   : > { %p1454_p1 = scmp.ne.s32.totalorder %s176_s9, %s1453_s26  ;;  %p1462_p6 = scmp.lt.s32.totalorder %s1453_s26, %s1453_s26 }
  0x28   : > { %p1456_p4 = pnand %p1454_p1, %p1442_p3  ;;  %p1463_p13 = por %p1462_p6, %p1461_p11 }
  0x2a   : > { %p1457_p12 = pneg %p1456_p4 }
  0x2c   : > { %p1464_p5 = pnand %p1463_p13, %p1457_p12 }
  0x2e   : > { %1467 = shalt.err (!%p1464_p5)
}
  0x2f   : > { %s1598_s8 = smov 64   ;;  %s1599_s11 = smov 4  }
  0x30   : > { %1359 = dma.hbm_to_vmem [thread:$0]  (!%p1704_p2), %s1970_s1, 1024, %s176_s9, [#allocation6], %s1598_s8, %s1598_s8, %s1599_s11  }
  0x31   : > { %s1468_s17 = scalar_lea.hbm %s1972_s3, 1024 }
  0x32   : > { %p1469_p4 = scmp.ne.s32.totalorder %s1972_s3, %s1468_s17  ;;  %p1475_p11 = scmp.lt.u32.totalorder %s1468_s17, %s1972_s3 }
  0x34   : > { %p1471_p5 = pnand %p1469_p4, %p1442_p3 }
  0x36   : > { %p1472_p6 = pneg %p1471_p5 }
  0x38   : > { %p1477_p12 = pnand %p1475_p11, %p1472_p6 }
  0x3a   : > { %1480 = shalt.err (!%p1477_p12)
}
  0x3b   : > { %s1481_s9 = scalar_lea.vmem %s1708_s12, 1024  ;;  %p1489_p8 = scmp.lt.s32.totalorder %s1708_s12, %s1708_s12 }
  0x3c   : > { %p1482_p13 = scmp.ne.s32.totalorder %s1708_s12, %s1481_s9  ;;  %p1490_p9 = scmp.lt.s32.totalorder %s1481_s9, %s1481_s9 }
  0x3e   : > { %p1484_p0 = pnand %p1482_p13, %p1442_p3  ;;  %p1491_p10 = por %p1490_p9, %p1489_p8 }
  0x40   : > { %p1485_p7 = pneg %p1484_p0 }
  0x42   : > { %p1492_p1 = pnand %p1491_p10, %p1485_p7 }
  0x44   : > { %1495 = shalt.err (!%p1492_p1)
}
  0x45   : > { %1362 = dma.hbm_to_vmem [thread:$0]  (!%p1704_p2), %s1972_s3, 1024, %s1708_s12, [#allocation6], %s1598_s8, %s1598_s8, %s1599_s11  }
  0x46   : > { %p1057_p4 = scmp.ge.s32.totalorder %s1594_s21, 3 }
  0x47   : > { %p1985_p5 = scmp.ne.s32.totalorder (!%p1057_p4), %s1979_s28, 0 }
  0x48   : > { %204 = sbr.rel (%p1057_p4) target bundleno = 114 (0x72), region = 32 }
  0x4f   : > { %207 = sbr.rel (!%p1985_p5) target bundleno = 114 (0x72), region = 36  ;;  %s208_s14 = sand.u32 (%p1985_p5), 1, %s1590_s20  }
  0x50   : > { %s213_s15 = smul.u32 (%p1985_p5), 24, %s1594_s21  ;;  %s1765_s25 = scalar_lea.sflag (%p1985_p5), [#allocation3], %s208_s14 }
  0x51   : > { %s1344_s16 = smul.u32 (%p1985_p5), 96, %s208_s14 }
  0x52   : > { %s214_s17 = ssub.s32 (%p1985_p5), 64, %s213_s15 }
  0x53   : > { %p215_p3 = scmp.lt.s32.totalorder (%p1985_p5), %s214_s17, 24  ;;  %s212_s12 = scalar_lea.vmem (%p1985_p5), [#allocation2], %s1344_s16 }
  0x56   : > { %s1998_s17 = smov (!%p215_p3, %s214_s17), 24 }
  0x57   : > { %s1762_s10 = sshll.u32 %s1998_s17, 6 }
  0x58   : > { %s219_s23 = ssub.s32 1536, %s1762_s10 }
  0x59   : > { %220 = vsyncadd %s1765_s25, %s219_s23  ;;  %p1059_p2 = scmp.ne.s32.totalorder %s1762_s10, 0  ;;  %s1127_s28 = smul.u32 1536, %s1594_s21 }
  0x5a   : > { %s225_s8 = sshll.u32 %s212_s12, 4  ;;  %s1500_s15 = scalar_lea.hbm %s1969_s0, 4096  ;;  %s1775_s8 = int_to_ptr.vmem [resolvable:$true] %s225_s8 }
  0x5b   : > { %s1773_s9 = scalar_lea.hbm %s1969_s0, %s1127_s28 }
  0x5c   : > { %s1496_s27 = scalar_lea.hbm %s1773_s9, %s1762_s10  ;;  %p1501_p13 = scmp.lt.u32.totalorder %s1773_s9, %s1969_s0 }
  0x5d   : > { %p1497_p6 = scmp.ne.s32.totalorder %s1773_s9, %s1496_s27  ;;  %p1502_p0 = scmp.lt.u32.totalorder %s1500_s15, %s1496_s27 }
  0x5e   : > { %p1504_p8 = scmp.lt.u32.totalorder %s1496_s27, %s1773_s9 }
  0x5f   : > { %p1498_p11 = pnand %p1497_p6, %p1059_p2  ;;  %p1503_p7 = por %p1502_p0, %p1501_p13 }
  0x61   : > { %p1499_p12 = pneg %p1498_p11  ;;  %p1505_p9 = por %p1504_p8, %p1503_p7 }
  0x63   : > { %p1506_p10 = pnand %p1505_p9, %p1499_p12 }
  0x65   : > { %1509 = shalt.err (!%p1506_p10)
}
  0x66   : > { %s1510_s23 = scalar_lea.vmem %s1775_s8, %s1762_s10  ;;  %s1600_s12 = smov [#allocation2]  }
  0x67   : > { %p1511_p1 = scmp.ne.s32.totalorder %s1775_s8, %s1510_s23  ;;  %s1514_s28 = sshll.u32 %s1600_s12, 4  ;;  %s1515_s28 = int_to_ptr.vmem [resolvable:$false] %s1514_s28 }
  0x68   : > { %s1516_s11 = scalar_lea.vmem %s1515_s28, 3072  ;;  %p1517_p3 = scmp.lt.s32.totalorder %s1775_s8, %s1515_s28 }
  0x69   : > { %p1512_p4 = pnand %p1511_p1, %p1059_p2  ;;  %p1518_p6 = scmp.lt.s32.totalorder %s1516_s11, %s1510_s23 }
  0x6b   : > { %p1513_p5 = pneg %p1512_p4  ;;  %p1519_p11 = por %p1518_p6, %p1517_p3 }
  0x6d   : > { %p1520_p13 = pnand %p1519_p11, %p1513_p5 }
  0x6f   : > { %1523 = shalt.err (!%p1520_p13)
}
  0x70   : > { %s1601_s26 = smov 64   ;;  %s1602_s27 = smov 4  }
  0x71   : > { %231 = dma.hbm_to_vmem [thread:$0]  (%p1059_p2), %s1773_s9, %s1762_s10, %s1775_s8, %s1765_s25, %s1601_s26, %s1601_s26, %s1602_s27  }
  0x72 PF: > { %p1986_p12 = scmp.ne.s32.totalorder %s1983_s7, 0 }
  0x73   : > { %s1805_s13 = sand.u32 (!%p1986_p12), 1, %s1586_s19   ;;  %p1987_p0 = scmp.ne.s32.totalorder (!%p1986_p12), %s1980_s29, 0 }
  0x74   : > { %237 = sbr.rel (%p1986_p12) target bundleno = 670 (0x29e), region = 40  ;;  %s240_s15 = scalar_lea.sflag (!%p1986_p12), [#allocation3], %s1805_s13 }
  0x75   : > { %s1345_s14 = smul.u32 (!%p1986_p12), 96, %s1805_s13 }
  0x77   : > { %s1811_s16 = scalar_lea.vmem (!%p1986_p12), [#allocation2], %s1345_s14 }
  0x7b   : > { %1569 = dma.done.wait (%p1987_p0), %s240_s15, 1536  }
  0x7c   : > { %1571 = vsyncadd (%p1987_p0), %s240_s15, 4294965760  ;;  %p1988_p2 = scmp.eq.s32.totalorder %s1657_s22, 0 }
  0x7e   : > { %1573 = dma.done.wait (%p1988_p2), [#allocation6], 2048   ;;  %p1989_p7 = pmov %p1988_p2 }
  0x7f   : > { %v1412_v0 = vld [vmem:[#allocation5] sm:$0xff]   ;;  %v1413_v1 = vld [vmem:[#allocation5 + $0x8] sm:$0xff]   ;;  %v1414_v2 = vld [vmem:[#allocation5 + $0x10] sm:$0xff]   ;;  %s1873_s8 = scalar_lea.vmem [#allocation8], %s1345_s14  ;;  %s942_s9 = scalar_lea.sflag [#allocation4], %s1805_s13 }
  0x80   : > { %1575 = vsyncadd (%p1989_p7), [#allocation6], 4294965248  ;;  %1264 = vmatprep.subr.bf16.mxu0 %v1412_v0  ;;  %v1415_v3 = vld [vmem:[#allocation5 + $0x18] sm:$0xff]   ;;  %v1420_v4 = vld [vmem:[%s1811_s16] sm:$0xff]   ;;  %p1990_p8 = scmp.ne.s32.totalorder %s1981_s30, 0 }
  0x81   : > { %1265 = vmatpush3.bf16.msra.mxu0 %v1412_v0  ;;  %1280 = vmatprep.mubr.bf16.mxu0 %v1420_v4  ;;  %v1416_v5 = vld [vmem:[#allocation5 + $0x20] sm:$0xff]   ;;  %v1417_v6 = vld [vmem:[#allocation5 + $0x28] sm:$0xff]   ;;  %v1418_v7 = vld [vmem:[#allocation5 + $0x30] sm:$0xff]   ;;  %s949_s17 = smul.u32 (%p1990_p8), 24, %s1657_s22 }
  0x82   : > { %1266 = vmatprep.subr.bf16.mxu0 %v1413_v1  ;;  %v1432_v8 = vld [vmem:[#allocation7] sm:$0xff]   ;;  %v1433_v9 = vld [vmem:[#allocation7 + $0x8] sm:$0xff]   ;;  %v1419_v10 = vld [vmem:[#allocation5 + $0x38] sm:$0xff]  }
  0x83   : > { %1304 = vmatprep.subr.bf16.mxu1 %v1432_v8  ;;  %v1434_v11 = vld [vmem:[#allocation7 + $0x10] sm:$0xff]   ;;  %v1435_v12 = vld [vmem:[#allocation7 + $0x18] sm:$0xff]   ;;  %v1421_v13 = vld [vmem:[%s1811_s16 + $0x8] sm:$0xff]   ;;  %s950_s23 = ssub.s32 (%p1990_p8), 64, %s949_s17 }
  0x84   : > { %1305 = vmatpush3.bf16.msra.mxu1 %v1432_v8  ;;  %v1422_v14 = vld [vmem:[%s1811_s16 + $0x10] sm:$0xff]   ;;  %v1436_v15 = vld [vmem:[#allocation7 + $0x20] sm:$0xff]   ;;  %v1437_v16 = vld [vmem:[#allocation7 + $0x28] sm:$0xff]   ;;  %p951_p9 = scmp.lt.s32.totalorder (%p1990_p8), %s950_s23, 24 }
  0x85   : > { %1267 = vmatpush3.bf16.msra.mxu0 %v1413_v1  ;;  %1306 = vmatprep.subr.bf16.mxu1 %v1433_v9  ;;  %v1423_v17 = vld [vmem:[%s1811_s16 + $0x18] sm:$0xff]   ;;  %v1424_v18 = vld [vmem:[%s1811_s16 + $0x20] sm:$0xff]   ;;  %v1425_v19 = vld [vmem:[%s1811_s16 + $0x28] sm:$0xff]  }
  0x86   : > { %1268 = vmatprep.subr.bf16.mxu0 %v1414_v2  ;;  %v1426_v20 = vld [vmem:[%s1811_s16 + $0x30] sm:$0xff]   ;;  %v1427_v21 = vld [vmem:[%s1811_s16 + $0x38] sm:$0xff]   ;;  %v1428_v22 = vld [vmem:[%s1811_s16 + $0x40] sm:$0xff]  }
  0x87   : > { %v1429_v23 = vld [vmem:[%s1811_s16 + $0x48] sm:$0xff]   ;;  %v1430_v24 = vld [vmem:[%s1811_s16 + $0x50] sm:$0xff]   ;;  %v1431_v25 = vld [vmem:[%s1811_s16 + $0x58] sm:$0xff]  }
  0x88   : > { %1307 = vmatpush3.bf16.msra.mxu1 %v1433_v9  ;;  %v1438_v26 = vld [vmem:[#allocation7 + $0x30] sm:$0xff]   ;;  %v1439_v27 = vld [vmem:[#allocation7 + $0x38] sm:$0xff]   ;;  %v1836_v28 = vld [vmem:[%s1971_s2] ss:$0 sm:$0xff] }
  0x89   : > { %1269 = vmatpush3.bf16.msra.mxu0 %v1414_v2  ;;  %1308 = vmatprep.subr.bf16.mxu1 %v1434_v11 }
  0x8a   : > { %1270 = vmatprep.subr.bf16.mxu0 %v1415_v3 }
  0x8c   : > { %1309 = vmatpush3.bf16.msra.mxu1 %v1434_v11 }
  0x8d   : > { %1271 = vmatpush3.bf16.msra.mxu0 %v1415_v3  ;;  %1310 = vmatprep.subr.bf16.mxu1 %v1435_v12 }
  0x8e   : > { %1272 = vmatprep.subr.bf16.mxu0 %v1416_v5 }
  0x90   : > { %1311 = vmatpush3.bf16.msra.mxu1 %v1435_v12 }
  0x91   : > { %1273 = vmatpush3.bf16.msra.mxu0 %v1416_v5  ;;  %1312 = vmatprep.subr.bf16.mxu1 %v1436_v15 }
  0x92   : > { %1274 = vmatprep.subr.bf16.mxu0 %v1417_v6 }
  0x94   : > { %1313 = vmatpush3.bf16.msra.mxu1 %v1436_v15 }
  0x95   : > { %1275 = vmatpush3.bf16.msra.mxu0 %v1417_v6  ;;  %1314 = vmatprep.subr.bf16.mxu1 %v1437_v16 }
  0x96   : > { %1276 = vmatprep.subr.bf16.mxu0 %v1418_v7 }
  0x98   : > { %1315 = vmatpush3.bf16.msra.mxu1 %v1437_v16 }
  0x99   : > { %1277 = vmatpush3.bf16.msra.mxu0 %v1418_v7  ;;  %1316 = vmatprep.subr.bf16.mxu1 %v1438_v26 }
  0x9a   : > { %1278 = vmatprep.subr.bf16.mxu0 %v1419_v10 }
  0x9c   : > { %1317 = vmatpush3.bf16.msra.mxu1 %v1438_v26 }
  0x9d   : > { %1279 = vmatpush3.bf16.msra.mxu0 %v1419_v10  ;;  %1318 = vmatprep.subr.bf16.mxu1 %v1439_v27 }
  0xa0   : > { %1281 = vmatmul.mubr.bf16.vlgmr.msra.gmra.mrb[0].mxu0 %v1421_v13  ;;  %1319 = vmatpush3.bf16.msra.mxu1 %v1439_v27 }
  0xa1   : > { %1284 = vmatprep.mubr.bf16.mxu0 %v1422_v14 }
  0xa8   : > { %1285 = vmatmul.mubr.bf16.gmra.mrb[4].mxu0 %v1423_v17 }
  0xa9   : > { %1288 = vmatprep.mubr.bf16.mxu0 %v1424_v18 }
  0xb0   : > { %1289 = vmatmul.mubr.bf16.gmra.mrb[8].mxu0 %v1425_v19 }
  0xb1   : > { %1292 = vmatprep.mubr.bf16.mxu0 %v1426_v20 }
  0xb8   : > { %1293 = vmatmul.mubr.bf16.gmra.mrb[12].mxu0 %v1427_v21 }
  0xb9   : > { %1296 = vmatprep.mubr.bf16.mxu0 %v1428_v22 }
  0xc0   : > { %1297 = vmatmul.mubr.bf16.gmra.mrb[16].mxu0 %v1429_v23 }
  0xc1   : > { %1300 = vmatprep.mubr.bf16.mxu0 %v1430_v24 }
  0xc8   : > { %1301 = vmatmul.mubr.bf16.gmra.mrb[20].mxu0 %v1431_v25 }
 0x173   : > { %v1282_v29 = vpop.f32.mrb[0].mxu0 }
 0x174   : > { %v499_v30 = vadd.f32 %v1282_v29, %v1836_v28  ;;  %v490_v31 = vpop.f32.mrb[1].mxu0 }
 0x175   : > { %v491_v32 = vadd.f32 %v1836_v28, %v490_v31  ;;  %v1283_v33 = vpop.f32.mrb[2].mxu0 }
 0x176   : > { %v502_v34 = vadd.f32 %v1283_v33, %v1836_v28  ;;  %v493_v35 = vpop.f32.mrb[3].mxu0  ;;  %v587_v37 = vmax.f32 %v499_v30, 0.0 }
 0x177   : > { %v494_v36 = vadd.f32 %v1836_v28, %v493_v35  ;;  %v585_v39 = vmax.f32 %v491_v32, 0.0 }
 0x178   : > { %v588_v38 = vmax.f32 %v502_v34, 0.0 }
 0x179   : > { %v586_v40 = vmax.f32 %v494_v36, 0.0 }
 0x17a   : > { %v610_v41 = vpack.c.bf16 %v588_v38, %v587_v37 }
 0x17b   : > { %v1286_v42 = vpop.f32.mrb[4].mxu0  ;;  %v609_v43 = vpack.c.bf16 %v586_v40, %v585_v39 }
 0x17c   : > { %v515_v44 = vadd.f32 %v1286_v42, %v1836_v28  ;;  %v506_v45 = vpop.f32.mrb[5].mxu0 }
 0x17d   : > { %v507_v46 = vadd.f32 %v1836_v28, %v506_v45  ;;  %v1287_v47 = vpop.f32.mrb[6].mxu0  ;;  %1320 = vmatprep.mubr.bf16.mxu1 %v609_v43 }
 0x17e   : > { %v518_v48 = vadd.f32 %v1287_v47, %v1836_v28  ;;  %v509_v49 = vpop.f32.mrb[7].mxu0  ;;  %1321 = vmatmul.mubr.bf16.vlgmr.msra.gmra.mrb[0].mxu1 %v610_v41  ;;  %v591_v51 = vmax.f32 %v515_v44, 0.0 }
 0x17f   : > { %v510_v50 = vadd.f32 %v1836_v28, %v509_v49  ;;  %v589_v53 = vmax.f32 %v507_v46, 0.0 }
 0x180   : > { %v592_v52 = vmax.f32 %v518_v48, 0.0 }
 0x181   : > { %v590_v54 = vmax.f32 %v510_v50, 0.0 }
 0x182   : > { %v612_v55 = vpack.c.bf16 %v592_v52, %v591_v51  ;;  %v1865_v51 = vld [vmem:[%s1973_s4] ss:$0 sm:$0xff] }
 0x183   : > { %v611_v56 = vpack.c.bf16 %v590_v54, %v589_v53  ;;  %v1290_v57 = vpop.f32.mrb[8].mxu0 }
 0x184   : > { %v531_v58 = vadd.f32 %v1290_v57, %v1836_v28  ;;  %v522_v59 = vpop.f32.mrb[9].mxu0 }
 0x185   : > { %v523_v60 = vadd.f32 %v1836_v28, %v522_v59  ;;  %v1291_v61 = vpop.f32.mrb[10].mxu0  ;;  %1324 = vmatprep.mubr.bf16.mxu1 %v611_v56 }
 0x186   : > { %v534_v62 = vadd.f32 %v1291_v61, %v1836_v28  ;;  %v525_v63 = vpop.f32.mrb[11].mxu0  ;;  %1325 = vmatmul.mubr.bf16.gmra.mrb[4].mxu1 %v612_v55  ;;  %v595_v1 = vmax.f32 %v531_v58, 0.0 }
 0x187   : > { %v526_v0 = vadd.f32 %v1836_v28, %v525_v63  ;;  %v593_v3 = vmax.f32 %v523_v60, 0.0 }
 0x188   : > { %v596_v2 = vmax.f32 %v534_v62, 0.0 }
 0x189   : > { %v594_v4 = vmax.f32 %v526_v0, 0.0 }
 0x18a   : > { %v614_v5 = vpack.c.bf16 %v596_v2, %v595_v1 }
 0x18b   : > { %v613_v6 = vpack.c.bf16 %v594_v4, %v593_v3  ;;  %v1294_v7 = vpop.f32.mrb[12].mxu0 }
 0x18c   : > { %v547_v8 = vadd.f32 %v1294_v7, %v1836_v28  ;;  %v538_v9 = vpop.f32.mrb[13].mxu0 }
 0x18d   : > { %v539_v10 = vadd.f32 %v1836_v28, %v538_v9  ;;  %v1295_v11 = vpop.f32.mrb[14].mxu0  ;;  %1328 = vmatprep.mubr.bf16.mxu1 %v613_v6 }
 0x18e   : > { %v550_v12 = vadd.f32 %v1295_v11, %v1836_v28  ;;  %v541_v13 = vpop.f32.mrb[15].mxu0  ;;  %1329 = vmatmul.mubr.bf16.gmra.mrb[8].mxu1 %v614_v5  ;;  %v599_v15 = vmax.f32 %v547_v8, 0.0 }
 0x18f   : > { %v542_v14 = vadd.f32 %v1836_v28, %v541_v13  ;;  %v597_v17 = vmax.f32 %v539_v10, 0.0 }
 0x190   : > { %v600_v16 = vmax.f32 %v550_v12, 0.0 }
 0x191   : > { %v598_v18 = vmax.f32 %v542_v14, 0.0 }
 0x192   : > { %v616_v19 = vpack.c.bf16 %v600_v16, %v599_v15 }
 0x193   : > { %v615_v20 = vpack.c.bf16 %v598_v18, %v597_v17  ;;  %v1298_v21 = vpop.f32.mrb[16].mxu0 }
 0x194   : > { %v563_v22 = vadd.f32 %v1298_v21, %v1836_v28  ;;  %v554_v23 = vpop.f32.mrb[17].mxu0 }
 0x195   : > { %v555_v24 = vadd.f32 %v1836_v28, %v554_v23  ;;  %v1299_v25 = vpop.f32.mrb[18].mxu0  ;;  %1332 = vmatprep.mubr.bf16.mxu1 %v615_v20 }
 0x196   : > { %v566_v26 = vadd.f32 %v1299_v25, %v1836_v28  ;;  %v557_v27 = vpop.f32.mrb[19].mxu0  ;;  %1333 = vmatmul.mubr.bf16.gmra.mrb[12].mxu1 %v616_v19  ;;  %v603_v30 = vmax.f32 %v563_v22, 0.0 }
 0x197   : > { %v558_v29 = vadd.f32 %v1836_v28, %v557_v27  ;;  %v601_v32 = vmax.f32 %v555_v24, 0.0 }
 0x198   : > { %v604_v31 = vmax.f32 %v566_v26, 0.0 }
 0x199   : > { %v602_v33 = vmax.f32 %v558_v29, 0.0 }
 0x19a   : > { %v618_v34 = vpack.c.bf16 %v604_v31, %v603_v30 }
 0x19b   : > { %v617_v35 = vpack.c.bf16 %v602_v33, %v601_v32  ;;  %v1302_v36 = vpop.f32.mrb[20].mxu0 }
 0x19c   : > { %v579_v37 = vadd.f32 %v1302_v36, %v1836_v28  ;;  %v570_v38 = vpop.f32.mrb[21].mxu0 }
 0x19d   : > { %v571_v39 = vadd.f32 %v1836_v28, %v570_v38  ;;  %v1303_v40 = vpop.f32.mrb[22].mxu0  ;;  %1336 = vmatprep.mubr.bf16.mxu1 %v617_v35 }
 0x19e   : > { %v582_v41 = vadd.f32 %v1303_v40, %v1836_v28  ;;  %v573_v42 = vpop.f32.mrb[23].mxu0  ;;  %1337 = vmatmul.mubr.bf16.gmra.mrb[16].mxu1 %v618_v34  ;;  %v607_v44 = vmax.f32 %v579_v37, 0.0 }
 0x19f   : > { %v574_v43 = vadd.f32 %v1836_v28, %v573_v42  ;;  %v605_v46 = vmax.f32 %v571_v39, 0.0 }
 0x1a0   : > { %v608_v45 = vmax.f32 %v582_v41, 0.0 }
 0x1a1   : > { %v606_v47 = vmax.f32 %v574_v43, 0.0 }
 0x1a2   : > { %v620_v48 = vpack.c.bf16 %v608_v45, %v607_v44 }
 0x1a3   : > { %v619_v49 = vpack.c.bf16 %v606_v47, %v605_v46 }
 0x1a5   : > { %1340 = vmatprep.mubr.bf16.mxu1 %v619_v49 }
 0x1a6   : > { %1341 = vmatmul.mubr.bf16.gmra.mrb[20].mxu1 %v620_v48 }
 0x251   : > { %v1322_v50 = vpop.f32.mrb[0].mxu1 }
 0x252   : > { %v726_v52 = vpop.f32.mrb[1].mxu1  ;;  %v735_v54 = vadd.f32 %v1322_v50, %v1865_v51 }
 0x253   : > { %v1323_v53 = vpop.f32.mrb[2].mxu1  ;;  %v727_v56 = vadd.f32 %v1865_v51, %v726_v52 }
 0x254   : > { %v738_v28 = vadd.f32 %v1323_v53, %v1865_v51  ;;  %v729_v55 = vpop.f32.mrb[3].mxu1 }
 0x255   : > { %v730_v57 = vadd.f32 %v1865_v51, %v729_v55 }
 0x256   : > { %v1161_v58 = vpack.c.bf16 %v738_v28, %v735_v54 }
 0x257   : > { %v1156_v59 = vpack.c.bf16 %v730_v57, %v727_v56 }
 0x258   : > { %1213 = vst [vmem:[%s1873_s8 + $0x8] sm:$0xff] %v1161_v58  }
 0x259   : > { %1157 = vst [vmem:[%s1873_s8] sm:$0xff] %v1156_v59   ;;  %v1326_v60 = vpop.f32.mrb[4].mxu1 }
 0x25a   : > { %v742_v61 = vpop.f32.mrb[5].mxu1  ;;  %v751_v63 = vadd.f32 %v1326_v60, %v1865_v51 }
 0x25b   : > { %v1327_v62 = vpop.f32.mrb[6].mxu1  ;;  %v743_v2 = vadd.f32 %v1865_v51, %v742_v61 }
 0x25c   : > { %v754_v0 = vadd.f32 %v1327_v62, %v1865_v51  ;;  %v745_v1 = vpop.f32.mrb[7].mxu1 }
 0x25d   : > { %v746_v3 = vadd.f32 %v1865_v51, %v745_v1 }
 0x25e   : > { %v1171_v4 = vpack.c.bf16 %v754_v0, %v751_v63 }
 0x25f   : > { %v1166_v5 = vpack.c.bf16 %v746_v3, %v743_v2 }
 0x260   : > { %1215 = vst [vmem:[%s1873_s8 + $0x18] sm:$0xff] %v1171_v4  }
 0x261   : > { %1214 = vst [vmem:[%s1873_s8 + $0x10] sm:$0xff] %v1166_v5   ;;  %v1330_v6 = vpop.f32.mrb[8].mxu1 }
 0x262   : > { %v758_v7 = vpop.f32.mrb[9].mxu1  ;;  %v767_v9 = vadd.f32 %v1330_v6, %v1865_v51 }
 0x263   : > { %v1331_v8 = vpop.f32.mrb[10].mxu1  ;;  %v759_v12 = vadd.f32 %v1865_v51, %v758_v7 }
 0x264   : > { %v770_v10 = vadd.f32 %v1331_v8, %v1865_v51  ;;  %v761_v11 = vpop.f32.mrb[11].mxu1 }
 0x265   : > { %v762_v13 = vadd.f32 %v1865_v51, %v761_v11 }
 0x266   : > { %v1181_v14 = vpack.c.bf16 %v770_v10, %v767_v9 }
 0x267   : > { %v1176_v15 = vpack.c.bf16 %v762_v13, %v759_v12 }
 0x268   : > { %1217 = vst [vmem:[%s1873_s8 + $0x28] sm:$0xff] %v1181_v14  }
 0x269   : > { %1216 = vst [vmem:[%s1873_s8 + $0x20] sm:$0xff] %v1176_v15   ;;  %v1334_v16 = vpop.f32.mrb[12].mxu1 }
 0x26a   : > { %v774_v17 = vpop.f32.mrb[13].mxu1  ;;  %v783_v19 = vadd.f32 %v1334_v16, %v1865_v51 }
 0x26b   : > { %v1335_v18 = vpop.f32.mrb[14].mxu1  ;;  %v775_v22 = vadd.f32 %v1865_v51, %v774_v17 }
 0x26c   : > { %v786_v20 = vadd.f32 %v1335_v18, %v1865_v51  ;;  %v777_v21 = vpop.f32.mrb[15].mxu1 }
 0x26d   : > { %v778_v23 = vadd.f32 %v1865_v51, %v777_v21 }
 0x26e   : > { %v1191_v24 = vpack.c.bf16 %v786_v20, %v783_v19 }
 0x26f   : > { %v1186_v25 = vpack.c.bf16 %v778_v23, %v775_v22 }
 0x270   : > { %1219 = vst [vmem:[%s1873_s8 + $0x38] sm:$0xff] %v1191_v24  }
 0x271   : > { %1218 = vst [vmem:[%s1873_s8 + $0x30] sm:$0xff] %v1186_v25   ;;  %v1338_v26 = vpop.f32.mrb[16].mxu1 }
 0x272   : > { %v790_v27 = vpop.f32.mrb[17].mxu1  ;;  %v799_v30 = vadd.f32 %v1338_v26, %v1865_v51 }
 0x273   : > { %v1339_v29 = vpop.f32.mrb[18].mxu1  ;;  %v791_v33 = vadd.f32 %v1865_v51, %v790_v27 }
 0x274   : > { %v802_v31 = vadd.f32 %v1339_v29, %v1865_v51  ;;  %v793_v32 = vpop.f32.mrb[19].mxu1 }
 0x275   : > { %v794_v34 = vadd.f32 %v1865_v51, %v793_v32 }
 0x276   : > { %v1201_v35 = vpack.c.bf16 %v802_v31, %v799_v30 }
 0x277   : > { %v1196_v36 = vpack.c.bf16 %v794_v34, %v791_v33 }
 0x278   : > { %1221 = vst [vmem:[%s1873_s8 + $0x48] sm:$0xff] %v1201_v35  }
 0x279   : > { %1220 = vst [vmem:[%s1873_s8 + $0x40] sm:$0xff] %v1196_v36   ;;  %v1342_v37 = vpop.f32.mrb[20].mxu1 }
 0x27a   : > { %v806_v38 = vpop.f32.mrb[21].mxu1  ;;  %v815_v40 = vadd.f32 %v1342_v37, %v1865_v51 }
 0x27b   : > { %v1343_v39 = vpop.f32.mrb[22].mxu1  ;;  %v807_v43 = vadd.f32 %v1865_v51, %v806_v38  ;;  %948 = sbr.rel (!%p1990_p8) target bundleno = 670 (0x29e), region = 56 }
 0x27c   : > { %v818_v41 = vadd.f32 %v1343_v39, %v1865_v51  ;;  %v809_v42 = vpop.f32.mrb[23].mxu1 }
 0x27d   : > { %v810_v44 = vadd.f32 %v1865_v51, %v809_v42 }
 0x27e   : > { %v1211_v45 = vpack.c.bf16 %v818_v41, %v815_v40 }
 0x27f   : > { %v1206_v46 = vpack.c.bf16 %v810_v44, %v807_v43 }
 0x280   : > { %1223 = vst [vmem:[%s1873_s8 + $0x58] sm:$0xff] %v1211_v45  }
 0x281   : > { %1222 = vst [vmem:[%s1873_s8 + $0x50] sm:$0xff] %v1206_v46  }
 0x282   : > { %s2000_s23 = smov (!%p951_p9, %s950_s23), 24 }
 0x283   : > { %s1911_s12 = sshll.u32 %s2000_s23, 6 }
 0x284   : > { %s955_s28 = ssub.s32 1536, %s1911_s12 }
 0x285   : > { %956 = vsyncadd %s942_s9, %s955_s28  ;;  %p1121_p10 = scmp.ne.s32.totalorder %s1911_s12, 0  ;;  %s1152_s30 = smul.u32 1536, %s1657_s22 }
 0x286   : > { %s961_s11 = sshll.u32 %s1873_s8, 4  ;;  %s1603_s16 = smov [#allocation8]   ;;  %s1924_s11 = int_to_ptr.vmem [resolvable:$true] %s961_s11 }
 0x287   : > { %s1922_s14 = scalar_lea.hbm %s1974_s5, %s1152_s30  ;;  %s1524_s15 = scalar_lea.vmem %s1924_s11, %s1911_s12 }
 0x288   : > { %p1525_p1 = scmp.ne.s32.totalorder %s1924_s11, %s1524_s15  ;;  %s1528_s29 = sshll.u32 %s1603_s16, 4  ;;  %s1529_s29 = int_to_ptr.vmem [resolvable:$false] %s1528_s29 }
 0x289   : > { %s1530_s22 = scalar_lea.vmem %s1529_s29, 3072  ;;  %p1531_p3 = scmp.lt.s32.totalorder %s1924_s11, %s1529_s29 }
 0x28a   : > { %p1526_p4 = pnand %p1525_p1, %p1121_p10  ;;  %p1532_p6 = scmp.lt.s32.totalorder %s1530_s22, %s1524_s15 }
 0x28c   : > { %p1527_p5 = pneg %p1526_p4  ;;  %p1533_p11 = por %p1532_p6, %p1531_p3 }
 0x28e   : > { %p1534_p13 = pnand %p1533_p11, %p1527_p5 }
 0x290   : > { %1537 = shalt.err (!%p1534_p13)
}
 0x291   : > { %s1538_s7 = scalar_lea.hbm %s1922_s14, %s1911_s12  ;;  %s1542_s8 = scalar_lea.hbm %s1974_s5, 4096 }
 0x292   : > { %p1539_p12 = scmp.ne.s32.totalorder %s1922_s14, %s1538_s7  ;;  %p1543_p7 = scmp.lt.u32.totalorder %s1922_s14, %s1974_s5 }
 0x293   : > { %p1544_p8 = scmp.lt.u32.totalorder %s1542_s8, %s1538_s7  ;;  %p1546_p1 = scmp.lt.u32.totalorder %s1538_s7, %s1922_s14 }
 0x294   : > { %p1540_p0 = pnand %p1539_p12, %p1121_p10 }
 0x295   : > { %p1545_p9 = por %p1544_p8, %p1543_p7 }
 0x296   : > { %p1541_p2 = pneg %p1540_p0 }
 0x297   : > { %p1547_p4 = por %p1546_p1, %p1545_p9 }
 0x299   : > { %p1548_p5 = pnand %p1547_p4, %p1541_p2 }
 0x29b   : > { %1551 = shalt.err (!%p1548_p5)
}
 0x29c   : > { %s1604_s28 = smov 64   ;;  %s1605_s30 = smov 4  }
 0x29d   : > { %967 = dma.vmem_to_hbm [thread:$0]  (%p1121_p10), %s1924_s11, %s1911_s12, %s1922_s14, %s942_s9, %s1604_s28, %s1604_s28, %s1605_s30  }
 0x29e PF: > { %p1371_p3 = scmp.ge.s32.totalorder %s1594_s21, 2  ;;  %s976_s26 = sand.u32 1, %s1582_s18  }
 0x29f   : > { %p1991_p6 = scmp.ne.s32.totalorder %s1982_s6, 0  ;;  %s977_s27 = scalar_lea.sflag [#allocation4], %s976_s26 }
 0x2a1   : > { %p1364_p11 = pnand %p1371_p3, %p1991_p6 }
 0x2a3   : > { %1577 = dma.done.wait (!%p1364_p11), %s977_s27, 1536  }
 0x2a4   : > { %1579 = vsyncadd (!%p1364_p11), %s977_s27, 4294965760  ;;  %s1992_s15 = sld [smem:[#allocation12_spill]]  ;;  %p19_p13 = scmp.ge.s32.totalorder %s1661_s24, 5  }
 0x2a5   : > { %s1993_s18 = smov %s1586_s19  ;;  %s1994_s19 = smov %s1590_s20 }
 0x2a6   : > { %s1996_s21 = smov %s1661_s24  ;;  %21 = sbr.rel (!%p19_p13) target bundleno = 6 (0x6), region = 93 }
 0x2aa   : > { %s1995_s20 = smov %s1992_s15 }
 0x2ad   :  { %982 = vsyncpa [#allocation3], 1 }
 0x2ae   :  { %984 = vsyncpa [#allocation3 + $0x1], 1 }
 0x2af   :  { %985 = vsyncpa [#allocation6], 1 }
 0x2b0   :  { %986 = vsyncpa [#allocation4], 1 }
 0x2b1   :  { %988 = vsyncpa [#allocation4 + $0x1], 1 }

</bundles_post_ra>
